<compile_context>
chip_gen: v7x
topology: tpu7x:2x2x1
jax: 0.10.0
libtpu: 0.0.40
codegen_flags: <defaults>
</compile_context>

<pallas_src>
import jax
import jax.numpy as jnp
from jax.experimental import pallas as pl
from jax.experimental.pallas import tpu as pltpu


def _soft_exponential_kernel(p_ref, x_ref, o_ref):
    # p_ref: (2,) f32 in SMEM = [alpha, 1/alpha (1.0 when alpha == 0)].
    a = p_ref[0]
    inv_a = p_ref[1]

    @pl.when(a == 0.0)
    def _():
        o_ref[...] = x_ref[...]

    @pl.when(a > 0.0)
    def _():
        x = x_ref[...].astype(jnp.float32)
        # Matches the PyTorch source (exp(a*x) - 1); exp/log are the
        # guaranteed Mosaic EUP paths.
        o_ref[...] = ((jnp.exp(a * x) - 1.0) * inv_a + a).astype(o_ref.dtype)

    @pl.when(a < 0.0)
    def _():
        x = x_ref[...].astype(jnp.float32)
        o_ref[...] = (-jnp.log(1.0 - a * (x + a)) * inv_a).astype(o_ref.dtype)


def soft_exponential(x, alpha):
    """Apply SoftExponential elementwise. x: any shape (e.g. NCHW), alpha: scalar."""
    orig_shape = x.shape
    xf = x.reshape(-1)          # native dtype, no cast
    n = xf.shape[0]

    # ---- lane-dense 2D slab (wrapper-side reshape only) ----
    lane = None
    for cand in (2048, 1024, 512, 256, 128):
        if n % cand == 0:
            lane = cand
            break
    padded = False
    if lane is None:
        # Rare for conv/linear activation shapes; tail-pad to one lane width only.
        lane = 128
        xf = jnp.pad(xf, (0, (-n) % lane))
        padded = True
    rows = xf.shape[0] // lane
    x2d = xf.reshape(rows, lane)

    # ---- block sizing: ~2 MiB per block, sublane multiple of 8 ----
    itemsize = jnp.dtype(x2d.dtype).itemsize
    target_rows = max(8, ((2 * 1024 * 1024) // (lane * itemsize)) // 8 * 8)
    if rows <= 16:
        row_block = rows                           # tiny input: one full-extent block
    elif rows <= target_rows:
        row_block = max(8, (rows // 2) // 8 * 8)   # >=2 grid steps (both v7x TCs busy)
    else:
        row_block = target_rows
    grid = (pl.cdiv(rows, row_block),)             # boundary block handled by Pallas

    # Scalar params in SMEM: [alpha, 1/alpha] (reciprocal hoisted out of the kernel).
    a32 = jnp.asarray(alpha, dtype=jnp.float32).reshape(())
    a_safe = jnp.where(a32 == 0.0, jnp.float32(1.0), a32)
    params = jnp.stack([a32, jnp.float32(1.0) / a_safe])

    out2d = pl.pallas_call(
        _soft_exponential_kernel,
        out_shape=jax.ShapeDtypeStruct((rows, lane), x2d.dtype),
        grid_spec=pl.GridSpec(
            grid=grid,
            in_specs=[
                pl.BlockSpec(memory_space=pltpu.SMEM),               # [alpha, 1/alpha]
                pl.BlockSpec((row_block, lane), lambda i: (i, 0)),   # x tile
            ],
            out_specs=pl.BlockSpec((row_block, lane), lambda i: (i, 0)),
        ),
        compiler_params=pltpu.CompilerParams(
            dimension_semantics=("parallel",),
        ),
    )(params, x2d)

    out = out2d.reshape(-1)
    if padded:
        out = out[:n]
    return out.reshape(orig_shape)


def _reference(x, alpha):
    a = jnp.float32(alpha)
    xf = x.astype(jnp.float32)
    if alpha == 0:
        return x
    elif alpha > 0:
        return ((jnp.exp(a * xf) - 1.0) / a + a).astype(x.dtype)
    else:
        return (-jnp.log(1.0 - a * (xf + a)) / a).astype(x.dtype)


if __name__ == "__main__":
    key = jax.random.PRNGKey(0)
    # Small NCHW input consistent with an activation applied after a conv.
    x = jax.random.normal(key, (2, 4, 16, 16), dtype=jnp.float32)

    # alpha > 0 path (matches nn.Parameter(torch.tensor(0.1)) default).
    alpha = 0.1
    out = jax.block_until_ready(soft_exponential(x, alpha))
    ref = _reference(x, alpha)
    assert out.shape == x.shape and out.dtype == x.dtype
    assert jnp.allclose(out, ref, atol=1e-5, rtol=1e-5), "mismatch (alpha > 0)"

    # Exercise the identity (alpha == 0) and log (alpha < 0) branches too.
    for a in (0.0, -0.05):
        o = jax.block_until_ready(soft_exponential(x, a))
        r = _reference(x, a)
        assert jnp.allclose(o, r, atol=1e-5, rtol=1e-5), f"mismatch (alpha = {a})"

    print("KERNEL_OK")
</pallas_src>

<mosaic_0001>
module attributes {stable_mosaic.version = 11 : i64} {
  func.func @_soft_exponential_kernel(%arg0: i32, %arg1: memref<2xf32, #tpu.memory_space<smem>>, %arg2: memref<1x2048xf32, #tpu.memory_space<vmem>>, %arg3: memref<1x2048xf32, #tpu.memory_space<vmem>>) attributes {dimension_semantics = [#tpu.dimension_semantics<parallel>], iteration_bounds = array<i64: 1>, scalar_prefetch = 0 : i64, scratch_operands = 0 : i64, tpu.core_type = #tpu.core_type<tc>, window_params = [{transform_indices = @transform_0, window_bounds = array<i64: 2>}, {transform_indices = @transform_1, window_bounds = array<i64: 1, 2048>}, {transform_indices = @transform_2, window_bounds = array<i64: 1, 2048>}]} {
    %c0 = arith.constant 0 : index
    %0 = memref.load %arg1[%c0] : memref<2xf32, #tpu.memory_space<smem>>
    %c1 = arith.constant 1 : index
    %1 = memref.load %arg1[%c1] : memref<2xf32, #tpu.memory_space<smem>>
    %cst = arith.constant 0.000000e+00 : f32
    %2 = arith.cmpf oeq, %0, %cst : f32
    %3 = arith.extui %2 : i1 to i32
    %c0_i32 = arith.constant 0 : i32
    %4 = arith.cmpi ne, %3, %c0_i32 : i32
    scf.if %4 {
      %c0_4 = arith.constant 0 : index
      %c0_5 = arith.constant 0 : index
      %11 = vector.load %arg2[%c0_4, %c0_5] : memref<1x2048xf32, #tpu.memory_space<vmem>>, vector<1x2048xf32>
      %c0_6 = arith.constant 0 : index
      %c0_7 = arith.constant 0 : index
      %12 = vector.load %arg3[%c0_6, %c0_7] : memref<1x2048xf32, #tpu.memory_space<vmem>>, vector<1x2048xf32>
      tpu.vector_store %arg3[%c0_6, %c0_7], %11 {strides = array<i32>} : memref<1x2048xf32, #tpu.memory_space<vmem>>, vector<1x2048xf32>,
    } else {
    }
    %cst_0 = arith.constant 0.000000e+00 : f32
    %5 = arith.cmpf ogt, %0, %cst_0 : f32
    %6 = arith.extui %5 : i1 to i32
    %c0_i32_1 = arith.constant 0 : i32
    %7 = arith.cmpi ne, %6, %c0_i32_1 : i32
    scf.if %7 {
      %c0_4 = arith.constant 0 : index
      %c0_5 = arith.constant 0 : index
      %11 = vector.load %arg2[%c0_4, %c0_5] : memref<1x2048xf32, #tpu.memory_space<vmem>>, vector<1x2048xf32>
      %12 = vector.broadcast %0 : f32 to vector<1x2048xf32>
      %13 = arith.mulf %12, %11 : vector<1x2048xf32>
      %14 = math.exp %13 : vector<1x2048xf32>
      %cst_6 = arith.constant 1.000000e+00 : f32
      %15 = vector.broadcast %cst_6 : f32 to vector<1x2048xf32>
      %16 = arith.subf %14, %15 : vector<1x2048xf32>
      %17 = vector.broadcast %1 : f32 to vector<1x2048xf32>
      %18 = arith.mulf %16, %17 : vector<1x2048xf32>
      %19 = vector.broadcast %0 : f32 to vector<1x2048xf32>
      %20 = arith.addf %18, %19 : vector<1x2048xf32>
      %c0_7 = arith.constant 0 : index
      %c0_8 = arith.constant 0 : index
      %21 = vector.load %arg3[%c0_7, %c0_8] : memref<1x2048xf32, #tpu.memory_space<vmem>>, vector<1x2048xf32>
      tpu.vector_store %arg3[%c0_7, %c0_8], %20 {strides = array<i32>} : memref<1x2048xf32, #tpu.memory_space<vmem>>, vector<1x2048xf32>,
    } else {
    }
    %cst_2 = arith.constant 0.000000e+00 : f32
    %8 = arith.cmpf olt, %0, %cst_2 : f32
    %9 = arith.extui %8 : i1 to i32
    %c0_i32_3 = arith.constant 0 : i32
    %10 = arith.cmpi ne, %9, %c0_i32_3 : i32
    scf.if %10 {
      %c0_4 = arith.constant 0 : index
      %c0_5 = arith.constant 0 : index
      %11 = vector.load %arg2[%c0_4, %c0_5] : memref<1x2048xf32, #tpu.memory_space<vmem>>, vector<1x2048xf32>
      %12 = vector.broadcast %0 : f32 to vector<1x2048xf32>
      %13 = arith.addf %11, %12 : vector<1x2048xf32>
      %14 = vector.broadcast %0 : f32 to vector<1x2048xf32>
      %15 = arith.mulf %14, %13 : vector<1x2048xf32>
      %cst_6 = arith.constant 1.000000e+00 : f32
      %16 = vector.broadcast %cst_6 : f32 to vector<1x2048xf32>
      %17 = arith.subf %16, %15 : vector<1x2048xf32>
      %18 = math.log %17 : vector<1x2048xf32>
      %cst_7 = arith.constant 0.000000e+00 : f32
      %19 = vector.broadcast %cst_7 : f32 to vector<1x2048xf32>
      %20 = arith.subf %19, %18 : vector<1x2048xf32>
      %21 = vector.broadcast %1 : f32 to vector<1x2048xf32>
      %22 = arith.mulf %20, %21 : vector<1x2048xf32>
      %c0_8 = arith.constant 0 : index
      %c0_9 = arith.constant 0 : index
      %23 = vector.load %arg3[%c0_8, %c0_9] : memref<1x2048xf32, #tpu.memory_space<vmem>>, vector<1x2048xf32>
      tpu.vector_store %arg3[%c0_8, %c0_9], %22 {strides = array<i32>} : memref<1x2048xf32, #tpu.memory_space<vmem>>, vector<1x2048xf32>,
    } else {
    }
    return
  }
  func.func @transform_0(%arg0: i32) -> i32 {
    %c0_i32 = arith.constant 0 : i32
    %c0_i32_0 = arith.constant 0 : i32
    return %c0_i32 : i32
  }
  func.func @transform_1(%arg0: i32) -> (i32, i32) {
    %c0_i32 = arith.constant 0 : i32
    %c0_i32_0 = arith.constant 0 : i32
    return %arg0, %c0_i32 : i32, i32
  }
  func.func @transform_2(%arg0: i32) -> (i32, i32) {
    %c0_i32 = arith.constant 0 : i32
    %c0_i32_0 = arith.constant 0 : i32
    return %arg0, %c0_i32 : i32, i32
  }
}

</mosaic_0001>

<bundles_post_ra>
// kernel: tpu_custom_call.1
= control target key start
LH: loop header
LB: loop body
LE: loop exit
PB: predicated region body
PF: predicated region fallthrough
CT: control target
= control target key end

     0   :  { %7 = vsyncpa [#allocation5], 0  ;;  %s246_s0 = inlined_call_operand.hbm [shape: f32[2], index: 0, kind: input, shape index: {}]   ;;  %s247_s1 = inlined_call_operand.hbm [shape: f32[1,2048], index: 1, kind: input, shape index: {}]   ;;  %s248_s2 = inlined_call_operand.hbm [shape: f32[1,2048], index: 2, kind: output, shape index: {}]  }
   0x1   :  { %8 = vsyncpa [#allocation3], 0 }
   0x2   :  { %9 = vsyncpa [#allocation4], 0  ;;  %s121_s11 = scalar_lea.hbm %s246_s0, 16 }
   0x3   :  { %p122_p0 = scmp.ne.s32.totalorder %s246_s0, %s121_s11  ;;  %p125_p1 = scmp.lt.u32.totalorder %s121_s11, %s246_s0 }
   0x5   :  { %p127_p2 = pnand %p125_p1, %p122_p0 }
   0x7   :  { %130 = shalt.err (!%p127_p2)
}
   0x8   :  { %s181_s16 = smov [#allocation2]   ;;  %s182_s19 = smov [#allocation6]  }
   0x9   :  { %17 = dma.hbm_to_smem %s246_s0, 16, %s181_s16, [#allocation5]  }
   0xa   :  { %s24_s20 = sshll.u32 %s182_s19, 4  ;;  %s131_s23 = scalar_lea.hbm %s247_s1, 256  ;;  %s25_s20 = int_to_ptr.vmem [resolvable:$true] %s24_s20 }
   0xb   :  { %p132_p3 = scmp.ne.s32.totalorder %s247_s1, %s131_s23  ;;  %p135_p4 = scmp.lt.u32.totalorder %s131_s23, %s247_s1 }
   0xd   :  { %p137_p5 = pnand %p135_p4, %p132_p3 }
   0xf   :  { %140 = shalt.err (!%p137_p5)
}
  0x10   :  { %s141_s28 = scalar_lea.vmem %s25_s20, 256  ;;  %p146_p7 = scmp.lt.s32.totalorder %s25_s20, %s25_s20 }
  0x11   :  { %p142_p6 = scmp.ne.s32.totalorder %s25_s20, %s141_s28  ;;  %p147_p8 = scmp.lt.s32.totalorder %s141_s28, %s141_s28 }
  0x13   :  { %p148_p9 = por %p147_p8, %p146_p7 }
  0x15   :  { %p149_p10 = pnand %p148_p9, %p142_p6 }
  0x17   :  { %152 = shalt.err (!%p149_p10)
}
  0x18   :  { %27 = dma.hbm_to_vmem [thread:$0]  %s247_s1, 256, %s25_s20, [#allocation3]  }
  0x19   :  { %175 = dma.done.wait [#allocation5], 16  }
  0x1a   :  { %176 = vsyncadd [#allocation5], 4294967280 }
  0x1b   :  { %177 = dma.done.wait [#allocation3], 256  }
  0x1c   :  { %178 = vsyncadd [#allocation3], 4294967040 }
  0x1d   :  { %34 = sfence }
  0x1e   :  { %s223_s30 = sld [smem:[#allocation2]]  ;;  %s225_s3 = sld [smem:[#allocation2 + $0x1]] }
  0x24   :  { %p37_p11 = scmp.eq.f32.partialorder %s223_s30, 0.0 }
  0x25   :  { %v41_v0 = vld [vmem:[#allocation6] sm:$0xff] (%p37_p11)  ;;  %v42_v1 = vld [vmem:[#allocation6 + $0x8] sm:$0xff] (%p37_p11) }
  0x26   :  { %40 = sbr.rel (!%p37_p11) target bundleno = 45 (0x2d), region = 21  ;;  %43 = vst [vmem:[#allocation7] sm:$0xff] (%p37_p11), %v41_v0  ;;  %44 = vst [vmem:[#allocation7 + $0x8] sm:$0xff] (%p37_p11), %v42_v1 }
  0x2d PF:  { %p45_p12 = scmp.gt.f32.partialorder %s223_s30, 0.0 }
  0x2e   :  { %v49_v2 = vld [vmem:[#allocation6] sm:$0xff] (%p45_p12)  ;;  %v51_v3 = vstv (%p45_p12), %s223_s30  ;;  %v50_v4 = vld [vmem:[#allocation6 + $0x8] sm:$0xff] (%p45_p12)  ;;  %v60_v10 = vstv (%p45_p12), %s225_s3 }
  0x2f   :  { %48 = sbr.rel (!%p45_p12) target bundleno = 70 (0x46), region = 25  ;;  %v52_v5 = vmul.f32 (%p45_p12), %v51_v3, %v49_v2  ;;  %v53_v6 = vmul.f32 (%p45_p12), %v51_v3, %v50_v4 }
  0x31   :  { %v54_v7 = vmul.f32 (%p45_p12), 1.442695, %v52_v5  ;;  %v56_v8 = vmul.f32 (%p45_p12), 1.442695, %v53_v6 }
  0x33   :  { %113 = vpow2.f32 (%p45_p12), %v54_v7 }
  0x34   :  { %115 = vpow2.f32 (%p45_p12), %v56_v8 }
  0x3d   :  { %v114_v9 = vpop.eup %113 }
  0x3e   :  { %v116_v11 = vpop.eup %115  ;;  %v108_v12 = vadd.f32 -1.0, %v114_v9 }
  0x3f   :  { %v109_v13 = vadd.f32 -1.0, %v116_v11 }
  0x40   :  { %v61_v14 = vmul.f32 %v108_v12, %v60_v10 }
  0x41   :  { %v62_v15 = vmul.f32 %v109_v13, %v60_v10 }
  0x42   :  { %v63_v16 = vadd.f32 %v61_v14, %v51_v3 }
  0x43   :  { %v64_v17 = vadd.f32 %v62_v15, %v51_v3 }
  0x44   :  { %65 = vst [vmem:[#allocation7] sm:$0xff] %v63_v16 }
  0x45   :  { %66 = vst [vmem:[#allocation7 + $0x8] sm:$0xff] %v64_v17 }
  0x46 PF:  { %p67_p13 = scmp.lt.f32.partialorder %s223_s30, 0.0 }
  0x47   :  { %v71_v18 = vld [vmem:[#allocation6] sm:$0xff] (%p67_p13)  ;;  %v73_v19 = vstv (%p67_p13), %s223_s30  ;;  %v72_v20 = vld [vmem:[#allocation6 + $0x8] sm:$0xff] (%p67_p13)  ;;  %v86_v30 = vstv (%p67_p13), %s225_s3 }
  0x48   :  { %70 = sbr.rel (!%p67_p13) target bundleno = 97 (0x61), region = 29  ;;  %v74_v21 = vadd.f32 (%p67_p13), %v73_v19, %v71_v18  ;;  %v75_v22 = vadd.f32 (%p67_p13), %v73_v19, %v72_v20 }
  0x4a   :  { %v76_v23 = vmul.f32 (%p67_p13), %v74_v21, %v73_v19  ;;  %v77_v24 = vmul.f32 (%p67_p13), %v75_v22, %v73_v19 }
  0x4c   :  { %v78_v25 = vsub.f32 (%p67_p13), 1.0, %v76_v23  ;;  %v79_v26 = vsub.f32 (%p67_p13), 1.0, %v77_v24 }
  0x4e   :  { %117 = vlog2.f32 (%p67_p13), %v78_v25 }
  0x4f   :  { %119 = vlog2.f32 %v79_v26 }
  0x58   :  { %v118_v27 = vpop.eup %117 }
  0x59   :  { %v120_v28 = vpop.eup %119  ;;  %v81_v29 = vmul.f32 0.6931472, %v118_v27 }
  0x5a   :  { %v83_v31 = vmul.f32 0.6931472, %v120_v28 }
  0x5b   :  { %v84_v32 = vsub.f32 0.0, %v81_v29 }
  0x5c   :  { %v85_v33 = vsub.f32 0.0, %v83_v31 }
  0x5d   :  { %v87_v34 = vmul.f32 %v86_v30, %v84_v32 }
  0x5e   :  { %v88_v35 = vmul.f32 %v86_v30, %v85_v33 }
  0x5f   :  { %89 = vst [vmem:[#allocation7] sm:$0xff] %v87_v34 }
  0x60   :  { %90 = vst [vmem:[#allocation7 + $0x8] sm:$0xff] %v88_v35 }
  0x61 PF:  { %s183_s1 = smov [#allocation7]  }
  0x62   :  { %s97_s4 = sshll.u32 %s183_s1, 4  ;;  %s98_s4 = int_to_ptr.vmem [resolvable:$true] %s97_s4 }
  0x63   :  { %s153_s5 = scalar_lea.vmem %s98_s4, 256  ;;  %p158_p1 = scmp.lt.s32.totalorder %s98_s4, %s98_s4 }
  0x64   :  { %p154_p0 = scmp.ne.s32.totalorder %s98_s4, %s153_s5  ;;  %p159_p2 = scmp.lt.s32.totalorder %s153_s5, %s153_s5 }
  0x66   :  { %p160_p3 = por %p159_p2, %p158_p1 }
  0x68   :  { %p161_p4 = pnand %p160_p3, %p154_p0 }
  0x6a   :  { %164 = shalt.err (!%p161_p4)
}
  0x6b   :  { %s165_s8 = scalar_lea.hbm %s248_s2, 256 }
  0x6c   :  { %p166_p5 = scmp.ne.s32.totalorder %s248_s2, %s165_s8  ;;  %p169_p6 = scmp.lt.u32.totalorder %s165_s8, %s248_s2 }
  0x6e   :  { %p171_p7 = pnand %p169_p6, %p166_p5 }
  0x70   :  { %174 = shalt.err (!%p171_p7)
}
  0x71   :  { %100 = dma.vmem_to_hbm [thread:$0]  %s98_s4, 256, %s248_s2, [#allocation4]  }
  0x72   :  { %179 = dma.done.wait [#allocation4], 256  }
  0x73   :  { %180 = vsyncadd [#allocation4], 4294967040 }
  0x74   :  { %104 = vsyncpa [#allocation3], 1 }
  0x75   :  { %105 = vsyncpa [#allocation4], 1 }
  0x76   :  { %106 = vsyncpa [#allocation5], 1 }

</bundles_post_ra>
